<compile_context>
chip_gen: v7x
topology: tpu7x:2x2x1
jax: 0.10.0
libtpu: 0.0.40
codegen_flags: <defaults>
</compile_context>

<pallas_src>
import math

import jax
import jax.numpy as jnp
from jax.experimental import pallas as pl
from jax.experimental.pallas import tpu as pltpu

_LANE = 128      # lane width: folded last dims are made multiples of this
_ROW = 16        # row-tile granularity (covers f32 (8,128) and bf16 (16,128))
_TM_CAP = 8192   # max folded rows per tile (per-step overhead amortized by then)


def _cdiv(a: int, b: int) -> int:
    return -(-a // b)


def _round_up(x: int, m: int) -> int:
    return _cdiv(x, m) * m


def _vmem_rows(r: int) -> int:
    # VMEM rounds the second-to-last dim up to the sublane count (8 for 32-bit).
    return max(8, _round_up(r, 8))


def _fold_factor(h: int, k: int, w_itemsize: int = 2,
                 max_weight_bytes: int = 4 << 20) -> int:
    """Rows folded per matmul row.  The minimal choice makes the folded output
    width fold*h lane-dense (multiple of 128); the lcm choice also makes the
    folded LHS width fold*k lane-dense when the resulting block-diagonal
    weight stays small."""
    f_h = _LANE // math.gcd(h, _LANE)
    f_k = _LANE // math.gcd(k, _LANE)
    f_lcm = f_h * f_k // math.gcd(f_h, f_k)
    for f in (f_lcm, f_h, 1):
        if f * k * f * h * w_itemsize <= max_weight_bytes:
            return f
    return 1


def _stream_tile(m_f: int, grid_m: int) -> int:
    if grid_m == 1:
        return m_f                      # block == full array dims (always legal)
    return _round_up(_cdiv(m_f, grid_m), _ROW)


def _row_map(nblk: int, grid_m: int):
    """Row-block index map; clamps to the last valid block when one stream has
    fewer blocks than the shared grid (revisits are idempotent)."""
    if nblk >= grid_m:
        return lambda i: (i, 0)
    last = nblk - 1
    return lambda i: (jnp.minimum(i, last), 0)


def _fused_patch_embed_kernel(xp_ref, xt_ref, wp_ref, bp_ref, wt_ref, bt_ref,
                              op_ref, ot_ref):
    """One grid step: project one folded row-tile of patches AND of text.

    xp: (tm_p, Fp*Kp) native  wp: (Fp*Kp, Fp*H) bf16  bp: (1, Fp*H) f32
    xt: (tm_t, Ft*Kt) native  wt: (Ft*Kt, Ft*H) bf16  bt: (1, Ft*H) f32
    """
    # In-kernel cast to the MXU input dtype: the VPU cast is free under a
    # memory-bound regime and halves input HBM bytes vs. a wrapper-side pass.
    xp = xp_ref[...].astype(wp_ref.dtype)
    op_ref[...] = (jnp.dot(xp, wp_ref[...], preferred_element_type=jnp.float32)
                   + bp_ref[...]).astype(op_ref.dtype)

    xt = xt_ref[...].astype(wt_ref.dtype)
    ot_ref[...] = (jnp.dot(xt, wt_ref[...], preferred_element_type=jnp.float32)
                   + bt_ref[...]).astype(ot_ref.dtype)


class PatchEmbedParams:
    """Deterministically-initialized parameters mirroring the PyTorch module.

    Weights are stored as (in, out) so the kernel does x @ W (== PyTorch x @ W^T).
    """

    def __init__(self, key, in_channels=4, hidden_dim=32, patch_size=2,
                 text_hidden_dim=64, dtype=jnp.float32):
        patch_dim = in_channels * patch_size ** 2
        k1, k2, k3, k4 = jax.random.split(key, 4)
        self.proj_w = jax.random.normal(k1, (patch_dim, hidden_dim), dtype) * 0.02
        self.proj_b = jax.random.normal(k2, (hidden_dim,), dtype) * 0.02
        self.text_w = jax.random.normal(k3, (text_hidden_dim, hidden_dim), dtype) * 0.02
        self.text_b = jax.random.normal(k4, (hidden_dim,), dtype) * 0.02
        self.hidden_dim = hidden_dim


def patch_embed_forward(params: PatchEmbedParams,
                        patches: jax.Array,
                        encoder_hidden_states: jax.Array,
                        *, out_dtype=None, compute_dtype=jnp.bfloat16):
    """patches: [B, N, in_channels*patch_size**2]; text: [B, L, text_hidden_dim].

    out_dtype defaults to the input dtype (exact module semantics); pass
    jnp.bfloat16 when downstream accepts it to halve output HBM bytes.
    """
    B, N, Kp = patches.shape
    Bt, L, Kt = encoder_hidden_states.shape
    H = params.hidden_dim
    if out_dtype is None:
        out_dtype = patches.dtype

    Mp, Mt = B * N, Bt * L
    w_b = jnp.dtype(compute_dtype).itemsize
    Fp = _fold_factor(H, Kp, w_itemsize=w_b)
    Ft = _fold_factor(H, Kt, w_itemsize=w_b)

    # ---- fold activations: (M, K) -> (M/F, F*K) (free reshape; tiny pad only
    #      when M is not a multiple of F) ------------------------------------
    def _fold_rows(x2d, fold):
        m, k = x2d.shape
        if m % fold:
            x2d = jnp.pad(x2d, ((0, fold - m % fold), (0, 0)))
        return x2d.reshape(x2d.shape[0] // fold, fold * k)

    xp_f = _fold_rows(patches.reshape(Mp, Kp), Fp)
    xt_f = _fold_rows(encoder_hidden_states.reshape(Mt, Kt), Ft)
    (Mp_f, Kp_f), (Mt_f, Kt_f) = xp_f.shape, xt_f.shape
    Hp_f, Ht_f = Fp * H, Ft * H

    # ---- block-diagonal weights / tiled biases (tiny, built once) ----------
    wp_bd = jnp.kron(jnp.eye(Fp, dtype=params.proj_w.dtype),
                     params.proj_w).astype(compute_dtype)      # (Fp*Kp, Fp*H)
    wt_bd = jnp.kron(jnp.eye(Ft, dtype=params.text_w.dtype),
                     params.text_w).astype(compute_dtype)      # (Ft*Kt, Ft*H)
    bp_f = jnp.tile(params.proj_b.astype(jnp.float32), Fp)[None, :]   # (1, Fp*H)
    bt_f = jnp.tile(params.text_b.astype(jnp.float32), Ft)[None, :]   # (1, Ft*H)

    # ---- per-generation VMEM budget & row tiling ----------------------------
    try:
        vmem_cap = int(getattr(pltpu.get_tpu_info(), "vmem_capacity_bytes",
                               64 * 1024 * 1024))
    except Exception:                      # conservative fallback
        vmem_cap = 64 * 1024 * 1024
    budget = (vmem_cap * 3) // 5           # ~76 MiB on 128 MiB parts, ~38 MiB on v7x

    in_bp = patches.dtype.itemsize
    in_bt = encoder_hidden_states.dtype.itemsize
    out_b = jnp.dtype(out_dtype).itemsize

    def vmem_need(tp, tt):
        # Everything is double-buffered by the default pipeline; last dims are
        # already lane-dense so the estimate is exact up to sublane rounding.
        return 2 * (_vmem_rows(tp) * Kp_f * in_bp + _vmem_rows(tt) * Kt_f * in_bt
                    + _vmem_rows(tp) * Hp_f * out_b + _vmem_rows(tt) * Ht_f * out_b
                    + _vmem_rows(Kp_f) * Hp_f * w_b + _vmem_rows(Kt_f) * Ht_f * w_b
                    + 8 * Hp_f * 4 + 8 * Ht_f * 4)

    Mmax_f = max(Mp_f, Mt_f)
    # Target >= ~8 grid steps when there is enough work (keeps both v7x TCs
    # busy and the double-buffer in steady state); cap tiles at _TM_CAP rows.
    grid_m = max(1, min(8, _cdiv(Mmax_f, _ROW)), _cdiv(Mmax_f, _TM_CAP))
    while True:
        tm_p = _stream_tile(Mp_f, grid_m)
        tm_t = _stream_tile(Mt_f, grid_m)
        if vmem_need(tm_p, tm_t) <= budget or (tm_p <= _ROW and tm_t <= _ROW):
            break
        grid_m *= 2

    nblk_p = _cdiv(Mp_f, tm_p)
    nblk_t = _cdiv(Mt_f, tm_t)
    # Row-parallel only when every grid step owns a distinct block of both
    # streams; otherwise run sequentially so clamped-index revisits of the last
    # block stay on a single core.
    sem = "parallel" if (nblk_p == grid_m and nblk_t == grid_m) else "arbitrary"

    need = vmem_need(tm_p, tm_t)
    vmem_limit = int(min(max(need + (2 << 20), 16 << 20), (vmem_cap * 3) // 4))

    out_p, out_t = pl.pallas_call(
        _fused_patch_embed_kernel,
        out_shape=(jax.ShapeDtypeStruct((Mp_f, Hp_f), out_dtype),
                   jax.ShapeDtypeStruct((Mt_f, Ht_f), out_dtype)),
        grid=(grid_m,),
        in_specs=[
            pl.BlockSpec((tm_p, Kp_f), _row_map(nblk_p, grid_m)),  # patch rows
            pl.BlockSpec((tm_t, Kt_f), _row_map(nblk_t, grid_m)),  # text rows
            pl.BlockSpec((Kp_f, Hp_f), lambda i: (0, 0)),          # patch W (resident)
            pl.BlockSpec((1, Hp_f), lambda i: (0, 0)),             # patch b (resident)
            pl.BlockSpec((Kt_f, Ht_f), lambda i: (0, 0)),          # text W  (resident)
            pl.BlockSpec((1, Ht_f), lambda i: (0, 0)),             # text b  (resident)
        ],
        out_specs=(
            pl.BlockSpec((tm_p, Hp_f), _row_map(nblk_p, grid_m)),  # lane-dense stores
            pl.BlockSpec((tm_t, Ht_f), _row_map(nblk_t, grid_m)),
        ),
        compiler_params=pltpu.CompilerParams(
            dimension_semantics=(sem,),
            vmem_limit_bytes=vmem_limit,
        ),
    )(xp_f, xt_f, wp_bd, bp_f, wt_bd, bt_f)

    # ---- un-fold: (M/F, F*H) -> (M, H) is a zero-cost reshape ---------------
    def _unfold(out, m, fold, b, s):
        y = out.reshape(out.shape[0] * fold, H)
        if y.shape[0] != m:            # only when M was padded to a fold multiple
            y = y[:m]
        return y.reshape(b, s, H)

    hidden_states = _unfold(out_p, Mp, Fp, B, N)
    text_states = _unfold(out_t, Mt, Ft, Bt, L)
    return hidden_states, text_states


if __name__ == "__main__":
    key = jax.random.PRNGKey(0)
    kp_, kx_, kt_ = jax.random.split(key, 3)

    # Small shapes consistent with the module:
    #   in_channels=4, patch_size=2 -> patch_dim=16; hidden_dim=32;
    #   text_hidden_dim=64; 16x16 latent -> N=64 patches; text length L=8.
    B, L = 2, 8
    in_channels, patch_size, hidden_dim, text_hidden_dim = 4, 2, 32, 64
    spatial = 16
    N = (spatial // patch_size) ** 2            # 64 patches
    patch_dim = in_channels * patch_size ** 2   # 16

    params = PatchEmbedParams(kp_, in_channels=in_channels, hidden_dim=hidden_dim,
                              patch_size=patch_size, text_hidden_dim=text_hidden_dim)

    patches = jax.random.normal(kx_, (B, N, patch_dim), jnp.float32)
    encoder_hidden_states = jax.random.normal(kt_, (B, L, text_hidden_dim), jnp.float32)

    fwd = jax.jit(lambda p, t: patch_embed_forward(params, p, t))
    hidden_states, text_states = fwd(patches, encoder_hidden_states)
    jax.block_until_ready((hidden_states, text_states))

    # --- Reference checks -----------------------------------------------------
    f32, bf16 = jnp.float32, jnp.bfloat16
    ref_h = (patches.astype(bf16).astype(f32) @ params.proj_w.astype(bf16).astype(f32)
             + params.proj_b)
    ref_t = (encoder_hidden_states.astype(bf16).astype(f32)
             @ params.text_w.astype(bf16).astype(f32) + params.text_b)

    assert hidden_states.shape == (B, N, hidden_dim)
    assert text_states.shape == (B, L, hidden_dim)
    # Tight: same math as the kernel (bf16 MXU inputs, f32 accumulate + bias).
    assert jnp.allclose(hidden_states, ref_h, atol=1e-4, rtol=1e-4)
    assert jnp.allclose(text_states, ref_t, atol=1e-4, rtol=1e-4)
    # Loose: tracks pure-f32 nn.Linear semantics.
    ref_h32 = patches @ params.proj_w + params.proj_b
    ref_t32 = encoder_hidden_states @ params.text_w + params.text_b
    assert jnp.allclose(hidden_states, ref_h32, atol=2e-2, rtol=2e-2)
    assert jnp.allclose(text_states, ref_t32, atol=2e-2, rtol=2e-2)

    # bf16 output path (halves the dominant output HBM stream).
    fwd_bf16 = jax.jit(lambda p, t: patch_embed_forward(params, p, t,
                                                        out_dtype=jnp.bfloat16))
    h_bf16, t_bf16 = fwd_bf16(patches, encoder_hidden_states)
    jax.block_until_ready((h_bf16, t_bf16))
    assert h_bf16.dtype == jnp.bfloat16 and t_bf16.dtype == jnp.bfloat16
    assert jnp.allclose(h_bf16.astype(f32), ref_h, atol=2e-2, rtol=2e-2)
    assert jnp.allclose(t_bf16.astype(f32), ref_t, atol=2e-2, rtol=2e-2)

    print("KERNEL_OK")
</pallas_src>

<mosaic_0001>
module attributes {stable_mosaic.version = 11 : i64} {
  func.func @_fused_patch_embed_kernel(%arg0: i32, %arg1: memref<16x128xf32, #tpu.memory_space<vmem>>, %arg2: memref<4x256xf32, #tpu.memory_space<vmem>>, %arg3: memref<128x256xbf16, #tpu.memory_space<vmem>>, %arg4: memref<1x256xf32, #tpu.memory_space<vmem>>, %arg5: memref<256x128xbf16, #tpu.memory_space<vmem>>, %arg6: memref<1x128xf32, #tpu.memory_space<vmem>>, %arg7: memref<16x256xf32, #tpu.memory_space<vmem>>, %arg8: memref<4x128xf32, #tpu.memory_space<vmem>>) attributes {dimension_semantics = [#tpu.dimension_semantics<parallel>], iteration_bounds = array<i64: 1>, scalar_prefetch = 0 : i64, scratch_operands = 0 : i64, tpu.core_type = #tpu.core_type<tc>, window_params = [{transform_indices = @transform_0, window_bounds = array<i64: 16, 128>}, {transform_indices = @transform_1, window_bounds = array<i64: 4, 256>}, {pipeline_mode = #tpu.pipeline_mode<synchronous>, transform_indices = @transform_2, window_bounds = array<i64: 128, 256>}, {pipeline_mode = #tpu.pipeline_mode<synchronous>, transform_indices = @transform_3, window_bounds = array<i64: 1, 256>}, {pipeline_mode = #tpu.pipeline_mode<synchronous>, transform_indices = @transform_4, window_bounds = array<i64: 256, 128>}, {pipeline_mode = #tpu.pipeline_mode<synchronous>, transform_indices = @transform_5, window_bounds = array<i64: 1, 128>}, {transform_indices = @transform_6, window_bounds = array<i64: 16, 256>}, {transform_indices = @transform_7, window_bounds = array<i64: 4, 128>}]} {
    %c0 = arith.constant 0 : index
    %c0_0 = arith.constant 0 : index
    %0 = vector.load %arg1[%c0, %c0_0] : memref<16x128xf32, #tpu.memory_space<vmem>>, vector<16x128xf32>
    %1 = arith.truncf %0 : vector<16x128xf32> to vector<16x128xbf16>
    %c0_1 = arith.constant 0 : index
    %c0_2 = arith.constant 0 : index
    %2 = vector.load %arg3[%c0_1, %c0_2] : memref<128x256xbf16, #tpu.memory_space<vmem>>, vector<128x256xbf16>
    %cst = arith.constant dense<0.000000e+00> : vector<16x256xf32>
    %3 = tpu.matmul %1, %2, %cst {dimension_numbers = #tpu.dot_dimension_numbers<[1], [0], [0], [1], [0, 0, 1, 1], [], []>} : vector<16x128xbf16>, vector<128x256xbf16>, vector<16x256xf32> -> vector<16x256xf32>
    %c0_3 = arith.constant 0 : index
    %c0_4 = arith.constant 0 : index
    %4 = vector.load %arg4[%c0_3, %c0_4] : memref<1x256xf32, #tpu.memory_space<vmem>>, vector<1x256xf32>
    %5 = vector.broadcast %4 : vector<1x256xf32> to vector<16x256xf32>
    %6 = arith.addf %3, %5 : vector<16x256xf32>
    %c0_5 = arith.constant 0 : index
    %c0_6 = arith.constant 0 : index
    %7 = vector.load %arg7[%c0_5, %c0_6] : memref<16x256xf32, #tpu.memory_space<vmem>>, vector<16x256xf32>
    tpu.vector_store %arg7[%c0_5, %c0_6], %6 {strides = array<i32>} : memref<16x256xf32, #tpu.memory_space<vmem>>, vector<16x256xf32>,
    %c0_7 = arith.constant 0 : index
    %c0_8 = arith.constant 0 : index
    %8 = vector.load %arg2[%c0_7, %c0_8] : memref<4x256xf32, #tpu.memory_space<vmem>>, vector<4x256xf32>
    %9 = arith.truncf %8 : vector<4x256xf32> to vector<4x256xbf16>
    %c0_9 = arith.constant 0 : index
    %c0_10 = arith.constant 0 : index
    %10 = vector.load %arg5[%c0_9, %c0_10] : memref<256x128xbf16, #tpu.memory_space<vmem>>, vector<256x128xbf16>
    %cst_11 = arith.constant dense<0.000000e+00> : vector<4x128xf32>
    %11 = tpu.matmul %9, %10, %cst_11 {dimension_numbers = #tpu.dot_dimension_numbers<[1], [0], [0], [1], [0, 0, 1, 1], [], []>} : vector<4x256xbf16>, vector<256x128xbf16>, vector<4x128xf32> -> vector<4x128xf32>
    %c0_12 = arith.constant 0 : index
    %c0_13 = arith.constant 0 : index
    %12 = vector.load %arg6[%c0_12, %c0_13] : memref<1x128xf32, #tpu.memory_space<vmem>>, vector<1x128xf32>
    %13 = vector.broadcast %12 : vector<1x128xf32> to vector<4x128xf32>
    %14 = arith.addf %11, %13 : vector<4x128xf32>
    %c0_14 = arith.constant 0 : index
    %c0_15 = arith.constant 0 : index
    %15 = vector.load %arg8[%c0_14, %c0_15] : memref<4x128xf32, #tpu.memory_space<vmem>>, vector<4x128xf32>
    tpu.vector_store %arg8[%c0_14, %c0_15], %14 {strides = array<i32>} : memref<4x128xf32, #tpu.memory_space<vmem>>, vector<4x128xf32>,
    return
  }
  func.func @transform_0(%arg0: i32) -> (i32, i32) {
    %c0_i32 = arith.constant 0 : i32
    %c0_i32_0 = arith.constant 0 : i32
    return %arg0, %c0_i32 : i32, i32
  }
  func.func @transform_1(%arg0: i32) -> (i32, i32) {
    %c0_i32 = arith.constant 0 : i32
    %c0_i32_0 = arith.constant 0 : i32
    return %arg0, %c0_i32 : i32, i32
  }
  func.func @transform_2(%arg0: i32) -> (i32, i32) {
    %c0_i32 = arith.constant 0 : i32
    %c0_i32_0 = arith.constant 0 : i32
    %c0_i32_1 = arith.constant 0 : i32
    return %c0_i32, %c0_i32_0 : i32, i32
  }
  func.func @transform_3(%arg0: i32) -> (i32, i32) {
    %c0_i32 = arith.constant 0 : i32
    %c0_i32_0 = arith.constant 0 : i32
    %c0_i32_1 = arith.constant 0 : i32
    return %c0_i32, %c0_i32_0 : i32, i32
  }
  func.func @transform_4(%arg0: i32) -> (i32, i32) {
    %c0_i32 = arith.constant 0 : i32
    %c0_i32_0 = arith.constant 0 : i32
    %c0_i32_1 = arith.constant 0 : i32
    return %c0_i32, %c0_i32_0 : i32, i32
  }
  func.func @transform_5(%arg0: i32) -> (i32, i32) {
    %c0_i32 = arith.constant 0 : i32
    %c0_i32_0 = arith.constant 0 : i32
    %c0_i32_1 = arith.constant 0 : i32
    return %c0_i32, %c0_i32_0 : i32, i32
  }
  func.func @transform_6(%arg0: i32) -> (i32, i32) {
    %c0_i32 = arith.constant 0 : i32
    %c0_i32_0 = arith.constant 0 : i32
    return %arg0, %c0_i32 : i32, i32
  }
  func.func @transform_7(%arg0: i32) -> (i32, i32) {
    %c0_i32 = arith.constant 0 : i32
    %c0_i32_0 = arith.constant 0 : i32
    return %arg0, %c0_i32 : i32, i32
  }
}

</mosaic_0001>

<bundles_post_ra>
// kernel: tile.10
= control target key start
LH: loop header
LB: loop body
LE: loop exit
PB: predicated region body
PF: predicated region fallthrough
CT: control target
= control target key end

     0   :  { %s22_s0 = inlined_call_operand.vmem [shape: f32[32], index: 0, kind: input, shape index: {}]   ;;  %s23_s1 = inlined_call_operand.vmem [shape: f32[8,32], index: 1, kind: output, shape index: {}]  }
   0x1   :  { %v4_v0 = vld [vmem:[%s22_s0] ss:$0 sm:$0xff] }
   0x2   :  { %5 = vst [vmem:[%s23_s1] sm:$0xff] %v4_v0 }

// kernel: tile.11
= control target key start
LH: loop header
LB: loop body
LE: loop exit
PB: predicated region body
PF: predicated region fallthrough
CT: control target
= control target key end

     0   :  { %s7_s6 = smov 3  ;;  %s14_s9 = smov 3  ;;  %vm4_vm0 = vcmask 261120   ;;  %vm11_vm1 = vcmask 1048320   ;;  %vm18_vm2 = vcmask 785920   ;;  %vm25_vm3 = vcmask 523520   ;;  %s76_s0 = inlined_call_operand.vmem [shape: f32[8,32], index: 0, kind: input, shape index: {}]   ;;  %s77_s1 = inlined_call_operand.vmem [shape: f32[1,256], index: 1, kind: output, shape index: {}]  }
   0x1   :  { %v38_v0 = vld [vmem:[%s76_s0 + $0x3] ss:$4 sm:%s7_s6]   ;;  %s45_s10 = smov 96   ;;  %s21_s11 = smov 3  ;;  %v39_v1 = vld [vmem:[%s76_s0 + $0x2] ss:$4 sm:%s14_s9]  }
   0x2   :  { %9 = vrot.lane.b32.xlu0 %v38_v0, %s45_s10  ;;  %v40_v2 = vld [vmem:[%s76_s0 + $0x1] ss:$4 sm:%s21_s11]   ;;  %s2_s16 = smov 3  ;;  %s46_s17 = smov 32  }
   0x3   :  { %23 = vrot.lane.b32.xlu1 %v40_v2, %s46_s17  ;;  %v3_v3 = vld [vmem:[%s76_s0] ss:$4 sm:%s2_s16]   ;;  %s47_s0 = smov 64  }
   0x4   :  { %5 = vst.msk [vmem:[#allocation0] ss:$8 sm:$0x3] %vm4_vm0, %v3_v3  }
   0x6   :  { %16 = vrot.lane.b32.xlu0 %v39_v1, %s47_s0 }
  0x74   :  { %v10_v4 = vpop.permute.xlu0 %9  }
  0x75   :  { %12 = vst.msk [vmem:[#allocation0] ss:$8 sm:$0x3] %vm11_vm1, %v10_v4   ;;  %v24_v5 = vpop.permute.xlu1 %23  }
  0x78   :  { %v17_v6 = vpop.permute.xlu0 %16  }
  0x79   :  { %19 = vst.msk [vmem:[#allocation0] ss:$8 sm:$0x3] %vm18_vm2, %v17_v6  }
  0x7a   :  { %26 = vst.msk [vmem:[#allocation0] ss:$8 sm:$0x3] %vm25_vm3, %v24_v5  }
  0x81   :  { %v30_v7 = vld [vmem:[#allocation0] sm:$0x1]  ;;  %v34_v8 = vld [vmem:[#allocation0 + $0x8] sm:$0x1] }
  0x82   :  { %32 = vst [vmem:[%s77_s1] sm:$0x1] %v30_v7  ;;  %41 = vst [vmem:[%s77_s1 + $0x1] sm:$0x1] %v34_v8 }

// kernel: tile.14
= control target key start
LH: loop header
LB: loop body
LE: loop exit
PB: predicated region body
PF: predicated region fallthrough
CT: control target
= control target key end

     0   :  { %s22_s0 = inlined_call_operand.vmem [shape: f32[32], index: 0, kind: input, shape index: {}]   ;;  %s23_s1 = inlined_call_operand.vmem [shape: f32[4,32], index: 1, kind: output, shape index: {}]  }
   0x1   :  { %v4_v0 = vld [vmem:[%s22_s0] ss:$0 sm:$0xff] }
   0x2   :  { %5 = vst [vmem:[%s23_s1] sm:$0xf] %v4_v0 }

// kernel: tile.15
= control target key start
LH: loop header
LB: loop body
LE: loop exit
PB: predicated region body
PF: predicated region fallthrough
CT: control target
= control target key end

     0   :  { %vm7_vm0 = vcmask 261120   ;;  %s37_s8 = smov 32   ;;  %s38_s9 = smov 64   ;;  %vm13_vm1 = vcmask 1048320   ;;  %vm19_vm2 = vcmask 785920   ;;  %vm25_vm3 = vcmask 523520   ;;  %s55_s0 = inlined_call_operand.vmem [shape: f32[4,32], index: 0, kind: input, shape index: {}]   ;;  %s56_s1 = inlined_call_operand.vmem [shape: f32[1,128], index: 1, kind: output, shape index: {}]  }
   0x1   :  { %v4_v0 = vld [vmem:[%s55_s0] sm:$0xf]  ;;  %s36_s0 = smov 96  }
   0x2   :  { %5 = vst [vmem:[#allocation1] sm:$0xf] %v4_v0 }
   0x9   :  { %v10_v1 = vld [vmem:[#allocation1 + $0x3] sm:$0x1]   ;;  %v22_v2 = vld [vmem:[#allocation1 + $0x1] sm:$0x1]   ;;  %v6_v3 = vld [vmem:[#allocation1] sm:$0x1]  }
   0xa   :  { %11 = vrot.lane.b32.xlu0 %v10_v1, %s36_s0  ;;  %23 = vrot.lane.b32.xlu1 %v22_v2, %s37_s8  ;;  %v16_v4 = vld [vmem:[#allocation1 + $0x2] sm:$0x1]   ;;  %8 = vst.msk [vmem:[#allocation0] sm:$0x1] %vm7_vm0, %v6_v3  }
   0xe   :  { %17 = vrot.lane.b32.xlu0 %v16_v4, %s38_s9 }
  0x7c   :  { %v12_v5 = vpop.permute.xlu0 %11   ;;  %v24_v6 = vpop.permute.xlu1 %23  }
  0x7d   :  { %14 = vst.msk [vmem:[#allocation0] sm:$0x1] %vm13_vm1, %v12_v5  }
  0x80   :  { %v18_v7 = vpop.permute.xlu0 %17  }
  0x81   :  { %20 = vst.msk [vmem:[#allocation0] sm:$0x1] %vm19_vm2, %v18_v7  }
  0x82   :  { %26 = vst.msk [vmem:[#allocation0] sm:$0x1] %vm25_vm3, %v24_v6  }
  0x89   :  { %v30_v8 = vld [vmem:[#allocation0] sm:$0x1] }
  0x8a   :  { %32 = vst [vmem:[%s56_s1] sm:$0x1] %v30_v8 }

// kernel: _lambda_.1
= control target key start
LH: loop header
LB: loop body
LE: loop exit
PB: predicated region body
PF: predicated region fallthrough
CT: control target
= control target key end

     0   :  { %v471_v1 = vmov 0   ;;  %v47_v40 = vlaneseq  ;;  %s638_s2 = inlined_call_operand.vmem [shape: bf16[128,256], index: 2, kind: input, shape index: {}]   ;;  %s639_s4 = inlined_call_operand.vmem [shape: bf16[256,128], index: 4, kind: input, shape index: {}]   ;;  %s640_s1 = inlined_call_operand.vmem [shape: f32[4,256], index: 1, kind: input, shape index: {}]   ;;  %s641_s0 = inlined_call_operand.vmem [shape: f32[16,128], index: 0, kind: input, shape index: {}]   ;;  %s642_s3 = inlined_call_operand.vmem [shape: f32[1,256], index: 3, kind: input, shape index: {}]   ;;  %s643_s5 = inlined_call_operand.vmem [shape: f32[1,128], index: 5, kind: input, shape index: {}]   ;;  %s644_s6 = inlined_call_operand.vmem [shape: f32[16,256], index: 6, kind: output, shape index: {0}]   ;;  %s645_s7 = inlined_call_operand.vmem [shape: f32[4,128], index: 7, kind: output, shape index: {1}]  }
   0x1   :  { %v430_v0 = vld [vmem:[%s638_s2 + $0x4] ss:$8 sps:$4 sm:$0xff]   ;;  %169 = vmatprep.mubr.bf16.mxu0 %v471_v1  ;;  %v433_v3 = vld [vmem:[%s638_s2] ss:$8 sps:$4 sm:$0xff]   ;;  %v435_v5 = vld [vmem:[%s638_s2 + $0x14] ss:$8 sps:$4 sm:$0xff]  }
   0x2   :  { %v432_v2 = vld [vmem:[%s639_s4 + $0x40] sm:$0xff]   ;;  %137 = vmatprep.subr.bf16.mxu0 %v430_v0  ;;  %v437_v6 = vld [vmem:[%s639_s4 + $0x48] sm:$0xff]   ;;  %v438_v7 = vld [vmem:[%s638_s2 + $0x10] ss:$8 sps:$4 sm:$0xff]   ;;  %v48_v41 = vshrl.u32 %v47_v40, 7 }
   0x3   :  { %407 = vmatprep.subr.bf16.mxu1 %v432_v2  ;;  %v434_v4 = vld [vmem:[%s639_s4] sm:$0xff]   ;;  %138 = vmatpush1.bf16.msra.mxu0 %v433_v3  ;;  %v439_v8 = vld [vmem:[%s639_s4 + $0x8] sm:$0xff]   ;;  %v442_v10 = vld [vmem:[%s639_s4 + $0x50] sm:$0xff]  }
   0x4   :  { %408 = vmatpush3.bf16.msra.mxu1 %v434_v4  ;;  %139 = vmatprep.subr.bf16.mxu0 %v435_v5  ;;  %v440_v9 = vld [vmem:[%s638_s2 + $0x24] ss:$8 sps:$4 sm:$0xff]   ;;  %v443_v11 = vld [vmem:[%s638_s2 + $0x20] ss:$8 sps:$4 sm:$0xff]   ;;  %v444_v12 = vld [vmem:[%s639_s4 + $0x10] sm:$0xff]   ;;  %v49_v42 = vsub.s32 0, %v48_v41 }
   0x5   :  { %409 = vmatprep.subr.bf16.mxu1 %v437_v6  ;;  %v445_v13 = vld [vmem:[%s638_s2 + $0x34] ss:$8 sps:$4 sm:$0xff]   ;;  %v448_v15 = vld [vmem:[%s638_s2 + $0x30] ss:$8 sps:$4 sm:$0xff]   ;;  %v450_v17 = vld [vmem:[%s638_s2 + $0x44] ss:$8 sps:$4 sm:$0xff]  }
   0x6   :  { %v447_v14 = vld [vmem:[%s639_s4 + $0x58] sm:$0xff]   ;;  %v452_v18 = vld [vmem:[%s639_s4 + $0x60] sm:$0xff]   ;;  %v457_v22 = vld [vmem:[%s639_s4 + $0x68] sm:$0xff]   ;;  %v53_v44 = vsub.s32 1, %v48_v41 }
   0x7   :  { %140 = vmatpush1.bf16.msra.mxu0 %v438_v7  ;;  %v449_v16 = vld [vmem:[%s639_s4 + $0x18] sm:$0xff]   ;;  %v453_v19 = vld [vmem:[%s638_s2 + $0x40] ss:$8 sps:$4 sm:$0xff]   ;;  %v460_v25 = vld [vmem:[%s638_s2 + $0x64] ss:$8 sps:$4 sm:$0xff]  }
   0x8   :  { %410 = vmatpush3.bf16.msra.mxu1 %v439_v8  ;;  %141 = vmatprep.subr.bf16.mxu0 %v440_v9  ;;  %v454_v20 = vld [vmem:[%s639_s4 + $0x20] sm:$0xff]   ;;  %v455_v21 = vld [vmem:[%s638_s2 + $0x54] ss:$8 sps:$4 sm:$0xff]   ;;  %v458_v23 = vld [vmem:[%s638_s2 + $0x50] ss:$8 sps:$4 sm:$0xff]  }
   0x9   :  { %411 = vmatprep.subr.bf16.mxu1 %v442_v10  ;;  %v459_v24 = vld [vmem:[%s639_s4 + $0x28] sm:$0xff]   ;;  %v462_v26 = vld [vmem:[%s639_s4 + $0x70] sm:$0xff]   ;;  %v467_v30 = vld [vmem:[%s639_s4 + $0x78] sm:$0xff]  }
   0xa   :  { %v463_v27 = vld [vmem:[%s638_s2 + $0x60] ss:$8 sps:$4 sm:$0xff]   ;;  %v464_v28 = vld [vmem:[%s639_s4 + $0x30] sm:$0xff]   ;;  %v469_v36 = vld [vmem:[%s639_s4 + $0x38] sm:$0xff]  }
   0xb   :  { %142 = vmatpush1.bf16.msra.mxu0 %v443_v11  ;;  %v465_v29 = vld [vmem:[%s638_s2 + $0x74] ss:$8 sps:$4 sm:$0xff]   ;;  %v184_v31 = vld [vmem:[%s640_s1] sm:$0xff]  ;;  %v468_v33 = vld [vmem:[%s638_s2 + $0x70] ss:$8 sps:$4 sm:$0xff]  }
   0xc   :  { %412 = vmatpush3.bf16.msra.mxu1 %v444_v12  ;;  %143 = vmatprep.subr.bf16.mxu0 %v445_v13  ;;  %v186_v32 = vcombine.high %v184_v31, %v184_v31  ;;  %v26_v34 = vld [vmem:[%s641_s0] sm:$0xff]  ;;  %v27_v35 = vld [vmem:[%s641_s0 + $0x8] sm:$0xff]  ;;  %v188_v39 = vpack.c.bf16 %v184_v31, %v184_v31 }
   0xd   :  { %413 = vmatprep.subr.bf16.mxu1 %v447_v14  ;;  %v28_v38 = vpack.c.bf16 %v27_v35, %v26_v34  ;;  %v45_v43 = vld [vmem:[%s642_s3] sm:$0x3] }
   0xe   :  { %v189_v37 = vpack.c.bf16 %v186_v32, %v186_v32  ;;  %v50_v45 = vrot.slane %v45_v43, %v49_v42  ;;  %v54_v46 = vrot.slane %v45_v43, %v53_v44  ;;  %v390_v52 = vld [vmem:[%s643_s5] ss:$0 sm:$0xff] }
   0xf   :  { %144 = vmatpush1.bf16.msra.mxu0 %v448_v15 }
  0x10   :  { %414 = vmatpush3.bf16.msra.mxu1 %v449_v16  ;;  %145 = vmatprep.subr.bf16.mxu0 %v450_v17 }
  0x11   :  { %415 = vmatprep.subr.bf16.mxu1 %v452_v18  ;;  %357 = vmatprep.mubr.bf16.mxu1 %v189_v37 }
  0x13   :  { %146 = vmatpush1.bf16.msra.mxu0 %v453_v19 }
  0x14   :  { %416 = vmatpush3.bf16.msra.mxu1 %v454_v20  ;;  %147 = vmatprep.subr.bf16.mxu0 %v455_v21 }
  0x15   :  { %417 = vmatprep.subr.bf16.mxu1 %v457_v22 }
  0x17   :  { %148 = vmatpush1.bf16.msra.mxu0 %v458_v23 }
  0x18   :  { %418 = vmatpush3.bf16.msra.mxu1 %v459_v24  ;;  %149 = vmatprep.subr.bf16.mxu0 %v460_v25 }
  0x19   :  { %419 = vmatprep.subr.bf16.mxu1 %v462_v26 }
  0x1b   :  { %150 = vmatpush1.bf16.msra.mxu0 %v463_v27 }
  0x1c   :  { %420 = vmatpush3.bf16.msra.mxu1 %v464_v28  ;;  %151 = vmatprep.subr.bf16.mxu0 %v465_v29 }
  0x1d   :  { %421 = vmatprep.subr.bf16.mxu1 %v467_v30 }
  0x1f   :  { %152 = vmatpush1.bf16.msra.mxu0 %v468_v33 }
  0x20   :  { %422 = vmatpush3.bf16.msra.mxu1 %v469_v36 }
  0x22   :  { %170 = vmatmul.mubr.bf16.vlgmr.msra.gmra.mrb[0].mxu0 %v28_v38 }
  0x23   :  { %358 = vmatmul.mubr.bf16.vlgmr.msra.gmra.mrb[0].mxu1 %v188_v39 }
  0xf5   :  { %v171_v47 = vpop.f32.mrb[0].mxu0 }
  0xf6   :  { %v172_v48 = vadd.f32 %v171_v47, %v50_v45  ;;  %v423_v49 = vpop.f32.mrb[0].mxu1  ;;  %v173_v50 = vpop.f32.mrb[1].mxu0 }
  0xf7   :  { %v174_v51 = vadd.f32 %v173_v50, %v54_v46  ;;  %v424_v53 = vpop.f32.mrb[1].mxu1  ;;  %v175_v54 = vpop.f32.mrb[2].mxu0 }
  0xf8   :  { %180 = vst [vmem:[%s644_s6] sm:$0xff] %v172_v48  ;;  %v425_v55 = vadd.f32 %v424_v53, %v423_v49  ;;  %v176_v56 = vadd.f32 %v175_v54, %v50_v45  ;;  %v426_v57 = vpop.f32.mrb[2].mxu1  ;;  %v177_v58 = vpop.f32.mrb[3].mxu0 }
  0xf9   :  { %181 = vst [vmem:[%s644_s6 + $0x8] sm:$0xff] %v174_v51  ;;  %v178_v59 = vadd.f32 %v177_v58, %v54_v46  ;;  %v427_v60 = vpop.f32.mrb[3].mxu1 }
  0xfa   :  { %v360_v61 = vadd.f32 %v425_v55, %v390_v52  ;;  %182 = vst [vmem:[%s644_s6 + $0x10] sm:$0xff] %v176_v56 }
  0xfb   :  { %183 = vst [vmem:[%s644_s6 + $0x18] sm:$0xff] %v178_v59 }
  0xfc   :  { %365 = vst [vmem:[%s645_s7] sm:$0xf] %v360_v61 }

</bundles_post_ra>
